<compile_context>
chip_gen: v5e
topology: v5e:2x2
jax: 0.10.0
libtpu: 0.0.40
codegen_flags: <defaults>
</compile_context>

<pallas_src>
import jax
import jax.numpy as jnp
from jax.experimental import pallas as pl
from jax.experimental.pallas import tpu as pltpu


def _outconv_kernel(x_ref, w_ref, b_ref, o_ref):
    # x_ref: (BN, Cin, TS)  activations, spatial dim lane-dense
    # w_ref: (Cout, Cin)    resident weight matrix
    # b_ref: (Cout, 1)      resident f32 bias column
    # o_ref: (BN, Cout, TS) lane-dense output tile
    w = w_ref[...]
    b = b_ref[...]
    # Static (small) batch-block loop; contraction is over Cin only, so any
    # garbage in OOB lanes of a ragged last block stays in masked output lanes.
    for i in range(x_ref.shape[0]):
        acc = jnp.dot(w, x_ref[i], preferred_element_type=jnp.float32)
        o_ref[i] = (acc + b).astype(o_ref.dtype)


def _round_up(x, m):
    return -(-x // m) * m


def _tpu_vmem_capacity_bytes():
    """Physical VMEM per TensorCore; conservative fallback if query fails."""
    try:
        info = pltpu.get_tpu_info()
        cap = getattr(info, "vmem_capacity_bytes", None)
        if cap:
            return int(cap)
    except Exception:
        pass
    return 64 * 1024 * 1024  # v7x-sized lower bound; safe on v5e/v6e too


def out_conv(x_nchw, weight, bias, *, max_tile_s=None):
    """1x1 Conv2d forward (== torch.nn.Conv2d(in, out, kernel_size=1)).

    x_nchw : (N, Cin, H, W)
    weight : (Cout, Cin, 1, 1)   -- PyTorch Conv2d layout
    bias   : (Cout,)
    returns: (N, Cout, H, W)
    """
    N, Cin, H, W = x_nchw.shape
    Cout = weight.shape[0]
    S = H * W
    dtype = x_nchw.dtype
    itemsize = jnp.dtype(dtype).itemsize

    # NCHW already has the big spatial dim contiguous and last: no transpose.
    x3 = x_nchw.reshape(N, Cin, S)
    w_mat = weight.reshape(Cout, Cin).astype(dtype)   # f32 stays f32
    b_col = bias.reshape(Cout, 1).astype(jnp.float32)

    # ---- tile selection -----------------------------------------------------
    # Sublane-padded channel counts (f32 -> 8, bf16 -> 16, int8/fp8 -> 32).
    sub = max(8, 32 // itemsize)
    cin_p = _round_up(Cin, sub)
    cout_p = _round_up(Cout, sub)

    # Generation-aware VMEM budget for the double-buffered streaming tiles.
    cap = _tpu_vmem_capacity_bytes()
    budget = max(8 << 20, min(cap // 4, 32 << 20))

    # Bytes per lane column: double-buffered input + output tile.
    per_col = (cin_p + cout_p) * itemsize * 2
    tile_cap = max(128, (budget // per_col) // 128 * 128)   # lanes
    if max_tile_s is not None:
        tile_cap = max(128, min(tile_cap, max_tile_s))

    S_lanes = _round_up(S, 128)
    if tile_cap >= S_lanes:
        # One (or more) full images per grid step: block the batch dimension.
        tile_s = S
        bn = int(min(N, max(1, tile_cap // S_lanes)))
    else:
        # Spatial tiling only; last block may be ragged (masked by Pallas).
        tile_s = tile_cap
        bn = 1

    nb = pl.cdiv(N, bn)
    ns = pl.cdiv(S, tile_s)

    # Keep >= 2 grid steps when the data allows, so v7x's two TensorCores both
    # get work (harmless on single-TC v5e/v6e).
    if nb * ns < 2:
        if N > 1:
            bn = -(-N // 2)
            nb = pl.cdiv(N, bn)
        elif S > 128:
            tile_s = _round_up(-(-S // 2), 128)
            ns = pl.cdiv(S, tile_s)

    # ---- right-sized VMEM limit ---------------------------------------------
    tile_lanes = _round_up(tile_s, 128)
    need = 2 * bn * (cin_p + cout_p) * tile_lanes * itemsize        # x + out, 2-buf
    need += _round_up(Cout, sub) * _round_up(Cin, 128) * itemsize   # resident W
    need += _round_up(Cout, 8) * 128 * 4                            # resident bias
    vmem_limit = int(min(max(need + (4 << 20), 16 << 20), 48 << 20))

    # ---- pallas_call ----------------------------------------------------------
    out3 = pl.pallas_call(
        _outconv_kernel,
        out_shape=jax.ShapeDtypeStruct((N, Cout, S), dtype),
        grid_spec=pltpu.PrefetchScalarGridSpec(
            num_scalar_prefetch=0,
            grid=(nb, ns),
            in_specs=[
                # activations: batch block x channels x lane-dense spatial tile
                pl.BlockSpec((bn, Cin, tile_s), lambda n, s: (n, 0, s)),
                # weight / bias: constant index_map -> resident in VMEM
                pl.BlockSpec((Cout, Cin), lambda n, s: (0, 0)),
                pl.BlockSpec((Cout, 1), lambda n, s: (0, 0)),
            ],
            out_specs=pl.BlockSpec((bn, Cout, tile_s), lambda n, s: (n, 0, s)),
        ),
        compiler_params=pltpu.CompilerParams(
            # Both grid axes are independent -> shards across v7x's 2 TCs.
            dimension_semantics=("parallel", "parallel"),
            vmem_limit_bytes=vmem_limit,
        ),
    )(x3, w_mat, b_col)

    # (N, Cout, S) is already NCHW once reshaped — no transpose, no slice.
    return out3.reshape(N, Cout, H, W)


if __name__ == "__main__":
    key = jax.random.PRNGKey(0)
    k_x, k_w, k_b = jax.random.split(key, 3)

    # Small shapes consistent with the module: N=2, Cin=4, Cout=8, H=W=16
    N, Cin, Cout, H, W = 2, 4, 8, 16, 16

    x = jax.random.normal(k_x, (N, Cin, H, W), dtype=jnp.float32)
    weight = jax.random.normal(k_w, (Cout, Cin, 1, 1), dtype=jnp.float32) * 0.1
    bias = jax.random.normal(k_b, (Cout,), dtype=jnp.float32) * 0.1

    out = jax.jit(out_conv)(x, weight, bias)
    jax.block_until_ready(out)

    # Reference check against lax conv semantics (same as torch Conv2d 1x1)
    ref = jax.lax.conv_general_dilated(
        x, weight, window_strides=(1, 1), padding="VALID",
        dimension_numbers=("NCHW", "OIHW", "NCHW"),
    ) + bias.reshape(1, Cout, 1, 1)
    assert out.shape == (N, Cout, H, W)
    assert jnp.allclose(out, ref, atol=1e-5, rtol=1e-5)

    print("KERNEL_OK")
</pallas_src>

<mosaic_0001>
module attributes {stable_mosaic.version = 11 : i64} {
  func.func @_outconv_kernel(%arg0: i32, %arg1: i32, %arg2: memref<1x4x256xf32, #tpu.memory_space<vmem>>, %arg3: memref<8x4xf32, #tpu.memory_space<vmem>>, %arg4: memref<8x1xf32, #tpu.memory_space<vmem>>, %arg5: memref<1x8x256xf32, #tpu.memory_space<vmem>>) attributes {dimension_semantics = [#tpu.dimension_semantics<parallel>, #tpu.dimension_semantics<parallel>], iteration_bounds = array<i64: 2, 1>, scalar_prefetch = 0 : i64, scratch_operands = 0 : i64, tpu.core_type = #tpu.core_type<tc>, window_params = [{transform_indices = @transform_0, window_bounds = array<i64: 1, 4, 256>}, {pipeline_mode = #tpu.pipeline_mode<synchronous>, transform_indices = @transform_1, window_bounds = array<i64: 8, 4>}, {pipeline_mode = #tpu.pipeline_mode<synchronous>, transform_indices = @transform_2, window_bounds = array<i64: 8, 1>}, {transform_indices = @transform_3, window_bounds = array<i64: 1, 8, 256>}]} {
    %c0 = arith.constant 0 : index
    %c0_0 = arith.constant 0 : index
    %0 = vector.load %arg3[%c0, %c0_0] : memref<8x4xf32, #tpu.memory_space<vmem>>, vector<8x4xf32>
    %c0_1 = arith.constant 0 : index
    %c0_2 = arith.constant 0 : index
    %1 = vector.load %arg4[%c0_1, %c0_2] : memref<8x1xf32, #tpu.memory_space<vmem>>, vector<8x1xf32>
    %c0_3 = arith.constant 0 : index
    %c0_4 = arith.constant 0 : index
    %c0_5 = arith.constant 0 : index
    %2 = vector.load %arg2[%c0_3, %c0_4, %c0_5] : memref<1x4x256xf32, #tpu.memory_space<vmem>>, vector<1x4x256xf32>
    %3 = vector.shape_cast %2 : vector<1x4x256xf32> to vector<4x256xf32>
    %cst = arith.constant dense<0.000000e+00> : vector<8x256xf32>
    %4 = tpu.matmul %0, %3, %cst {dimension_numbers = #tpu.dot_dimension_numbers<[1], [0], [0], [1], [0, 0, 1, 1], [], []>} : vector<8x4xf32>, vector<4x256xf32>, vector<8x256xf32> -> vector<8x256xf32>
    %5 = vector.broadcast %1 : vector<8x1xf32> to vector<8x256xf32>
    %6 = arith.addf %4, %5 : vector<8x256xf32>
    %c0_6 = arith.constant 0 : index
    %c0_7 = arith.constant 0 : index
    %c0_8 = arith.constant 0 : index
    %7 = vector.load %arg5[%c0_6, %c0_7, %c0_8] : memref<1x8x256xf32, #tpu.memory_space<vmem>>, vector<1x8x256xf32>
    %8 = vector.shape_cast %7 : vector<1x8x256xf32> to vector<8x256xf32>
    %9 = vector.shape_cast %6 : vector<8x256xf32> to vector<1x8x256xf32>
    tpu.vector_store %arg5[%c0_6, %c0_7, %c0_8], %9 {strides = array<i32>} : memref<1x8x256xf32, #tpu.memory_space<vmem>>, vector<1x8x256xf32>,
    return
  }
  func.func @transform_0(%arg0: i32, %arg1: i32) -> (i32, i32, i32) {
    %c0_i32 = arith.constant 0 : i32
    %c0_i32_0 = arith.constant 0 : i32
    return %arg0, %c0_i32, %arg1 : i32, i32, i32
  }
  func.func @transform_1(%arg0: i32, %arg1: i32) -> (i32, i32) {
    %c0_i32 = arith.constant 0 : i32
    %c0_i32_0 = arith.constant 0 : i32
    %c0_i32_1 = arith.constant 0 : i32
    return %c0_i32, %c0_i32_0 : i32, i32
  }
  func.func @transform_2(%arg0: i32, %arg1: i32) -> (i32, i32) {
    %c0_i32 = arith.constant 0 : i32
    %c0_i32_0 = arith.constant 0 : i32
    %c0_i32_1 = arith.constant 0 : i32
    return %c0_i32, %c0_i32_0 : i32, i32
  }
  func.func @transform_3(%arg0: i32, %arg1: i32) -> (i32, i32, i32) {
    %c0_i32 = arith.constant 0 : i32
    %c0_i32_0 = arith.constant 0 : i32
    return %arg0, %c0_i32, %arg1 : i32, i32, i32
  }
}

</mosaic_0001>

<bundles_post_ra>
// kernel: out_conv.1
= control target key start
LH: loop header
LB: loop body
LE: loop exit
PB: predicated region body
PF: predicated region fallthrough
CT: control target
= control target key end

     0   :  { %s448_s12 = smov 0   ;;  %s450_s13 = smov 0   ;;  %s487_s0 = inlined_call_operand.vmem [shape: f32[2,4,256], index: 0, kind: input, shape index: {}]   ;;  %s488_s1 = inlined_call_operand.vmem [shape: f32[8,4], index: 1, kind: input, shape index: {}]   ;;  %s489_s2 = inlined_call_operand.vmem [shape: f32[8,1], index: 2, kind: input, shape index: {}]   ;;  %s490_s3 = inlined_call_operand.vmem [shape: f32[2,8,256], index: 3, kind: output, shape index: {}]  }
   0x1   :  { %s452_s14 = smov 0  }
   0x2 LB: > { %s25_s15 = sadd.s32 1, %s421_s13  ;;  %p364_p0 = scmp.ge.s32.totalorder %s425_s14, 1  ;;  %s425_s14 = sphi %s452_s14, %s13_s14   ;;  %s421_s13 = sphi %s450_s13, %s492_s13   ;;  %s417_s12 = sphi %s448_s12, %s491_s12  }
   0x3   : > { %p27_p1 = scmp.ge.s32.totalorder %s25_s15, 2  ;;  %p158_p2 = scmp.lt.s32.totalorder %s425_s14, 3 }
   0x5   : > { %s494_s15 = smov (%p27_p1, %s25_s15), 0  ;;  %p159_p3 = pnand %p364_p0, %p158_p2 }
   0x6   : > { %p191_p4 = scmp.lt.s32.totalorder (!%p159_p3), %s417_s12, 1 }
   0x7   : > { %162 = sbr.rel (%p159_p3) target bundleno = 155 (0x9b), region = 32 }
   0xc   : > { %v211_v0 = vld [vmem:[%s489_s2] sm:$0xff]  ;;  %v427_v1 = vmov 0   ;;  %s496_s12 = smov (!%p191_p4, %s417_s12), 1  ;;  %vm226_vm0 = vcmask 1043456   ;;  %vm222_vm1 = vcmask 31744  }
   0xd   : > { %402 = vset.pattern.permute.xlu0 %v427_v1  ;;  %s375_s18 = sshll.u32 %s496_s12, 3  ;;  %v210_v3 = vld [vmem:[%s488_s1] sm:$0xff]  ;;  %s376_s24 = sshll.u32 %s496_s12, 4 }
   0xe   : > { %215 = vperm.xlu0 %402, %v211_v0   ;;  %s198_s21 = scalar_lea.vmem %s487_s0, %s375_s18  ;;  %s208_s27 = scalar_lea.vmem %s490_s3, %s376_s24 }
   0xf   : > { %v212_v2 = vld [vmem:[%s198_s21] sm:$0xff] }
  0x10   : > { %219 = vst [vmem:[#allocation1] ss:$2 sm:$0xff] %v212_v2 }
  0x17   : > { %v220_v4 = vld.sshfl [vmem:[#allocation1] sm:$0xff pattern:$0x75316420]  ;;  %v221_v5 = vld.sshfl [vmem:[#allocation1 + $0x8] sm:$0xff pattern:$0x75316420] }
  0x18   : > { %369 = vmatpush.msk.msra.mxu0 %vm226_vm0, %v220_v4  ;;  %371 = vmatpush.msk.msra.mxu1 %vm226_vm0, %v221_v5 }
  0x19   : > { %370 = vmatmul.msk.f32.vlgmr.msra.gmra.mxu0 %vm222_vm1, %v210_v3  ;;  %372 = vmatmul.msk.f32.vlgmr.msra.gmra.mxu1 %vm222_vm1, %v210_v3 }
  0x80   : > { %v216_v6 = vpop.permute.xlu0 %215 }
  0x96   : > { %v248_v7 = vpop.f32.mrf.mxu0  ;;  %v268_v8 = vpop.f32.mrf.mxu1 }
  0x97   : > { %v249_v9 = vadd.f32 %v248_v7, %v216_v6  ;;  %v269_v10 = vadd.f32 %v268_v8, %v216_v6 }
  0x99   : > { %271 = vst [vmem:[%s208_s27] sm:$0xff] %v249_v9 }
  0x9a   : > { %272 = vst [vmem:[%s208_s27 + $0x8] sm:$0xff] %v269_v10 }
  0x9b PF: > { %s13_s14 = sadd.s32 1, %s425_s14   ;;  %s491_s12 = smov %s421_s13 }
  0x9c   : > { %p10_p5 = scmp.ge.s32.totalorder %s13_s14, 4   ;;  %s492_s13 = smov %s494_s15 }
  0x9e   :  { %12 = sbr.rel (!%p10_p5) target bundleno = 2 (0x2), region = 62 }

</bundles_post_ra>
